<compile_context>
chip_gen: v7x
topology: tpu7x:2x2x1
jax: 0.10.0
libtpu: 0.0.40
codegen_flags: <defaults>
</compile_context>

<pallas_src>
import functools

import jax
import jax.numpy as jnp
from jax.experimental import pallas as pl
from jax.experimental.pallas import tpu as pltpu


def _conv_kernel(x_ref, w_ref, b_ref, o_ref, *, KH, KW, W, P, BN):
    """One batch block of Conv2d(C, O, kernel=KHxKW, stride 1, padding 0).

    x_ref: (BN, C_pad, Lpad) f32 -- spatially flattened input, channels zero-padded
    w_ref: (KH*KW, O, C_pad) f32 -- per-tap weight matrices, channels zero-padded
    b_ref: (O, 1) f32
    o_ref: (BN, O, P) f32        -- P = OH*W lane-dense slab (last KW-1 lanes of each
                                    output row are junk; cropped in the wrapper)
    """
    bias = b_ref[...]                                      # (O, 1), lane-broadcast add
    for n in range(BN):                                    # BN <= 8: bounded unroll
        x = x_ref[n]                                       # (C_pad, Lpad) single load
        acc = None
        for kh in range(KH):
            for kw in range(KW):
                off = kh * W + kw                          # static lane offset
                tap = x[:, off:off + P]                    # cheap lane-shifted view
                part = jnp.dot(w_ref[kh * KW + kw], tap,
                               preferred_element_type=jnp.float32)  # (O, P)
                acc = part if acc is None else acc + part
        o_ref[n] = (acc + bias).astype(o_ref.dtype)


def _tensorcores_per_chip():
    # 2 TensorCores per chip on v7x; 1 on v5e/v6e.  Best-effort detection only.
    try:
        kind = jax.devices()[0].device_kind.lower()
    except Exception:
        return 1
    return 2 if "7" in kind else 1


def _pick_block_n(N, per_image_bytes, *, min_steps, max_unroll=8, vmem_budget=8 << 20):
    # Largest divisor of N that (a) keeps the double-buffered per-step working set
    # under a conservative budget (fits the 16 MiB v5e default scoped VMEM), (b) keeps
    # trace unrolling bounded, and (c) leaves >= min_steps grid steps when possible so
    # the "parallel" axis can shard across v7x's two TensorCores.
    divisors = [d for d in range(1, N + 1) if N % d == 0]
    fitting = [d for d in divisors
               if d <= max_unroll and 2 * d * per_image_bytes <= vmem_budget]
    if not fitting:
        return 1
    preferred = [d for d in fitting if N // d >= min_steps]
    return max(preferred) if preferred else max(fitting)


def wengnet_forward(x, w, b, *, block_n=None):
    """Conv2d(3, 64, k=3, stride=1, padding=0) forward via a Pallas TPU kernel.

    x: (N, 3, H, W) float32, NCHW
    w: (64, 3, 3, 3) float32, OIHW
    b: (64,) float32
    returns: (N, 64, H-2, W-2) float32
    """
    N, C, H, W = x.shape
    O, Cw, KH, KW = w.shape
    assert C == Cw
    OH, OW = H - KH + 1, W - KW + 1
    P = OH * W                                   # lane-dense output slab width
    C_pad = 8                                    # sublane-tile aligned channels (f32)
    Lpad = -(-(H * W + KW - 1) // 128) * 128     # flattened input, full lane groups

    per_image_bytes = (C_pad * Lpad + O * P) * 4
    if block_n is None:
        block_n = _pick_block_n(N, per_image_bytes,
                                min_steps=_tensorcores_per_chip())
    assert N % block_n == 0

    # Wrapper-side prep (cheap XLA ops, outside the kernel):
    #   input : NCHW -> (N, C_pad, Lpad) spatially flattened, zero padded
    #   weight: OIHW -> (KH*KW, O, C_pad) per-tap matrices, zero-padded channels
    #   bias  : (O, 1) column for a fused lane-broadcast add in the epilogue
    x_flat = jnp.pad(x.reshape(N, C, H * W).astype(jnp.float32),
                     ((0, 0), (0, C_pad - C), (0, Lpad - H * W)))
    w_taps = jnp.pad(
        w.astype(jnp.float32).transpose(2, 3, 0, 1).reshape(KH * KW, O, C),
        ((0, 0), (0, 0), (0, C_pad - C)))
    b_col = b.reshape(O, 1).astype(jnp.float32)

    kernel = functools.partial(_conv_kernel, KH=KH, KW=KW, W=W, P=P, BN=block_n)

    # TODO(synk): for very large H*W (e.g. 224x224 on v7x's 64 MiB VMEM) add an
    # OH row-block grid axis with a manual halo DMA (memory_space=pl.ANY); not
    # needed at the block sizes selected by the VMEM-budget heuristic here.
    out_flat = pl.pallas_call(
        kernel,
        out_shape=jax.ShapeDtypeStruct((N, O, P), jnp.float32),
        grid_spec=pltpu.PrefetchScalarGridSpec(
            num_scalar_prefetch=0,
            grid=(N // block_n,),
            in_specs=[
                pl.BlockSpec((block_n, C_pad, Lpad), lambda n: (n, 0, 0)),
                pl.BlockSpec((KH * KW, O, C_pad), lambda n: (0, 0, 0)),
                pl.BlockSpec((O, 1), lambda n: (0, 0)),
            ],
            out_specs=pl.BlockSpec((block_n, O, P), lambda n: (n, 0, 0)),
        ),
        compiler_params=pltpu.CompilerParams(
            dimension_semantics=("parallel",),
        ),
    )(x_flat, w_taps, b_col)

    # Lane-dense (N, O, OH*W) -> NCHW, cropping the KW-1 junk lanes per output row.
    return out_flat.reshape(N, O, OH, W)[:, :, :, :OW].astype(x.dtype)


if __name__ == "__main__":
    key = jax.random.PRNGKey(0)
    k_x, k_w, k_b = jax.random.split(key, 3)

    # Small shapes consistent with Conv2d(3, 64, kernel_size=3): NCHW input.
    N, C, H, W = 2, 3, 16, 16
    O, KH, KW = 64, 3, 3

    x = jax.random.normal(k_x, (N, C, H, W), dtype=jnp.float32)
    # Deterministic "PyTorch-like" init (uniform in +/- 1/sqrt(fan_in)).
    fan_in = C * KH * KW
    bound = 1.0 / (fan_in ** 0.5)
    w = jax.random.uniform(k_w, (O, C, KH, KW), jnp.float32, -bound, bound)
    b = jax.random.uniform(k_b, (O,), jnp.float32, -bound, bound)

    out = jax.block_until_ready(wengnet_forward(x, w, b))

    # Sanity check against XLA's conv (same NCHW/OIHW semantics as PyTorch).
    ref = jax.lax.conv_general_dilated(
        x, w, window_strides=(1, 1), padding="VALID",
        dimension_numbers=("NCHW", "OIHW", "NCHW"),
    ) + b.reshape(1, O, 1, 1)
    assert out.shape == (N, O, H - 2, W - 2), out.shape
    # f32 operands with f32 accumulation; tolerance covers the MXU's default
    # multi-pass f32 matmul rounding.
    assert jnp.allclose(out, ref, atol=2e-2, rtol=2e-3), float(
        jnp.max(jnp.abs(out - ref))
    )

    print("KERNEL_OK")
</pallas_src>

<mosaic_0001>
module attributes {stable_mosaic.version = 11 : i64} {
  func.func @_conv_kernel(%arg0: i32, %arg1: memref<2x8x384xf32, #tpu.memory_space<vmem>>, %arg2: memref<9x64x8xf32, #tpu.memory_space<vmem>>, %arg3: memref<64x1xf32, #tpu.memory_space<vmem>>, %arg4: memref<2x64x224xf32, #tpu.memory_space<vmem>>) attributes {dimension_semantics = [#tpu.dimension_semantics<parallel>], iteration_bounds = array<i64: 1>, scalar_prefetch = 0 : i64, scratch_operands = 0 : i64, tpu.core_type = #tpu.core_type<tc>, window_params = [{transform_indices = @transform_0, window_bounds = array<i64: 2, 8, 384>}, {pipeline_mode = #tpu.pipeline_mode<synchronous>, transform_indices = @transform_1, window_bounds = array<i64: 9, 64, 8>}, {pipeline_mode = #tpu.pipeline_mode<synchronous>, transform_indices = @transform_2, window_bounds = array<i64: 64, 1>}, {transform_indices = @transform_3, window_bounds = array<i64: 2, 64, 224>}]} {
    %c0 = arith.constant 0 : index
    %c0_0 = arith.constant 0 : index
    %0 = vector.load %arg3[%c0, %c0_0] : memref<64x1xf32, #tpu.memory_space<vmem>>, vector<64x1xf32>
    %c0_1 = arith.constant 0 : index
    %c0_2 = arith.constant 0 : index
    %c0_3 = arith.constant 0 : index
    %1 = vector.load %arg1[%c0_1, %c0_2, %c0_3] : memref<2x8x384xf32, #tpu.memory_space<vmem>>, vector<1x8x384xf32>
    %2 = vector.shape_cast %1 : vector<1x8x384xf32> to vector<8x384xf32>
    %3 = vector.extract_strided_slice %2 {offsets = [0, 0], sizes = [8, 224], strides = [1, 1]} : vector<8x384xf32> to vector<8x224xf32>
    %c0_4 = arith.constant 0 : index
    %c0_5 = arith.constant 0 : index
    %c0_6 = arith.constant 0 : index
    %4 = vector.load %arg2[%c0_4, %c0_5, %c0_6] : memref<9x64x8xf32, #tpu.memory_space<vmem>>, vector<1x64x8xf32>
    %5 = vector.shape_cast %4 : vector<1x64x8xf32> to vector<64x8xf32>
    %cst = arith.constant dense<0.000000e+00> : vector<64x224xf32>
    %6 = tpu.matmul %5, %3, %cst {dimension_numbers = #tpu.dot_dimension_numbers<[1], [0], [0], [1], [0, 0, 1, 1], [], []>} : vector<64x8xf32>, vector<8x224xf32>, vector<64x224xf32> -> vector<64x224xf32>
    %7 = vector.extract_strided_slice %2 {offsets = [0, 1], sizes = [8, 224], strides = [1, 1]} : vector<8x384xf32> to vector<8x224xf32>
    %c1 = arith.constant 1 : index
    %c0_7 = arith.constant 0 : index
    %c0_8 = arith.constant 0 : index
    %8 = vector.load %arg2[%c1, %c0_7, %c0_8] : memref<9x64x8xf32, #tpu.memory_space<vmem>>, vector<1x64x8xf32>
    %9 = vector.shape_cast %8 : vector<1x64x8xf32> to vector<64x8xf32>
    %cst_9 = arith.constant dense<0.000000e+00> : vector<64x224xf32>
    %10 = tpu.matmul %9, %7, %cst_9 {dimension_numbers = #tpu.dot_dimension_numbers<[1], [0], [0], [1], [0, 0, 1, 1], [], []>} : vector<64x8xf32>, vector<8x224xf32>, vector<64x224xf32> -> vector<64x224xf32>
    %11 = arith.addf %6, %10 : vector<64x224xf32>
    %12 = vector.extract_strided_slice %2 {offsets = [0, 2], sizes = [8, 224], strides = [1, 1]} : vector<8x384xf32> to vector<8x224xf32>
    %c2 = arith.constant 2 : index
    %c0_10 = arith.constant 0 : index
    %c0_11 = arith.constant 0 : index
    %13 = vector.load %arg2[%c2, %c0_10, %c0_11] : memref<9x64x8xf32, #tpu.memory_space<vmem>>, vector<1x64x8xf32>
    %14 = vector.shape_cast %13 : vector<1x64x8xf32> to vector<64x8xf32>
    %cst_12 = arith.constant dense<0.000000e+00> : vector<64x224xf32>
    %15 = tpu.matmul %14, %12, %cst_12 {dimension_numbers = #tpu.dot_dimension_numbers<[1], [0], [0], [1], [0, 0, 1, 1], [], []>} : vector<64x8xf32>, vector<8x224xf32>, vector<64x224xf32> -> vector<64x224xf32>
    %16 = arith.addf %11, %15 : vector<64x224xf32>
    %17 = vector.extract_strided_slice %2 {offsets = [0, 16], sizes = [8, 224], strides = [1, 1]} : vector<8x384xf32> to vector<8x224xf32>
    %c3 = arith.constant 3 : index
    %c0_13 = arith.constant 0 : index
    %c0_14 = arith.constant 0 : index
    %18 = vector.load %arg2[%c3, %c0_13, %c0_14] : memref<9x64x8xf32, #tpu.memory_space<vmem>>, vector<1x64x8xf32>
    %19 = vector.shape_cast %18 : vector<1x64x8xf32> to vector<64x8xf32>
    %cst_15 = arith.constant dense<0.000000e+00> : vector<64x224xf32>
    %20 = tpu.matmul %19, %17, %cst_15 {dimension_numbers = #tpu.dot_dimension_numbers<[1], [0], [0], [1], [0, 0, 1, 1], [], []>} : vector<64x8xf32>, vector<8x224xf32>, vector<64x224xf32> -> vector<64x224xf32>
    %21 = arith.addf %16, %20 : vector<64x224xf32>
    %22 = vector.extract_strided_slice %2 {offsets = [0, 17], sizes = [8, 224], strides = [1, 1]} : vector<8x384xf32> to vector<8x224xf32>
    %c4 = arith.constant 4 : index
    %c0_16 = arith.constant 0 : index
    %c0_17 = arith.constant 0 : index
    %23 = vector.load %arg2[%c4, %c0_16, %c0_17] : memref<9x64x8xf32, #tpu.memory_space<vmem>>, vector<1x64x8xf32>
    %24 = vector.shape_cast %23 : vector<1x64x8xf32> to vector<64x8xf32>
    %cst_18 = arith.constant dense<0.000000e+00> : vector<64x224xf32>
    %25 = tpu.matmul %24, %22, %cst_18 {dimension_numbers = #tpu.dot_dimension_numbers<[1], [0], [0], [1], [0, 0, 1, 1], [], []>} : vector<64x8xf32>, vector<8x224xf32>, vector<64x224xf32> -> vector<64x224xf32>
    %26 = arith.addf %21, %25 : vector<64x224xf32>
    %27 = vector.extract_strided_slice %2 {offsets = [0, 18], sizes = [8, 224], strides = [1, 1]} : vector<8x384xf32> to vector<8x224xf32>
    %c5 = arith.constant 5 : index
    %c0_19 = arith.constant 0 : index
    %c0_20 = arith.constant 0 : index
    %28 = vector.load %arg2[%c5, %c0_19, %c0_20] : memref<9x64x8xf32, #tpu.memory_space<vmem>>, vector<1x64x8xf32>
    %29 = vector.shape_cast %28 : vector<1x64x8xf32> to vector<64x8xf32>
    %cst_21 = arith.constant dense<0.000000e+00> : vector<64x224xf32>
    %30 = tpu.matmul %29, %27, %cst_21 {dimension_numbers = #tpu.dot_dimension_numbers<[1], [0], [0], [1], [0, 0, 1, 1], [], []>} : vector<64x8xf32>, vector<8x224xf32>, vector<64x224xf32> -> vector<64x224xf32>
    %31 = arith.addf %26, %30 : vector<64x224xf32>
    %32 = vector.extract_strided_slice %2 {offsets = [0, 32], sizes = [8, 224], strides = [1, 1]} : vector<8x384xf32> to vector<8x224xf32>
    %c6 = arith.constant 6 : index
    %c0_22 = arith.constant 0 : index
    %c0_23 = arith.constant 0 : index
    %33 = vector.load %arg2[%c6, %c0_22, %c0_23] : memref<9x64x8xf32, #tpu.memory_space<vmem>>, vector<1x64x8xf32>
    %34 = vector.shape_cast %33 : vector<1x64x8xf32> to vector<64x8xf32>
    %cst_24 = arith.constant dense<0.000000e+00> : vector<64x224xf32>
    %35 = tpu.matmul %34, %32, %cst_24 {dimension_numbers = #tpu.dot_dimension_numbers<[1], [0], [0], [1], [0, 0, 1, 1], [], []>} : vector<64x8xf32>, vector<8x224xf32>, vector<64x224xf32> -> vector<64x224xf32>
    %36 = arith.addf %31, %35 : vector<64x224xf32>
    %37 = vector.extract_strided_slice %2 {offsets = [0, 33], sizes = [8, 224], strides = [1, 1]} : vector<8x384xf32> to vector<8x224xf32>
    %c7 = arith.constant 7 : index
    %c0_25 = arith.constant 0 : index
    %c0_26 = arith.constant 0 : index
    %38 = vector.load %arg2[%c7, %c0_25, %c0_26] : memref<9x64x8xf32, #tpu.memory_space<vmem>>, vector<1x64x8xf32>
    %39 = vector.shape_cast %38 : vector<1x64x8xf32> to vector<64x8xf32>
    %cst_27 = arith.constant dense<0.000000e+00> : vector<64x224xf32>
    %40 = tpu.matmul %39, %37, %cst_27 {dimension_numbers = #tpu.dot_dimension_numbers<[1], [0], [0], [1], [0, 0, 1, 1], [], []>} : vector<64x8xf32>, vector<8x224xf32>, vector<64x224xf32> -> vector<64x224xf32>
    %41 = arith.addf %36, %40 : vector<64x224xf32>
    %42 = vector.extract_strided_slice %2 {offsets = [0, 34], sizes = [8, 224], strides = [1, 1]} : vector<8x384xf32> to vector<8x224xf32>
    %c8 = arith.constant 8 : index
    %c0_28 = arith.constant 0 : index
    %c0_29 = arith.constant 0 : index
    %43 = vector.load %arg2[%c8, %c0_28, %c0_29] : memref<9x64x8xf32, #tpu.memory_space<vmem>>, vector<1x64x8xf32>
    %44 = vector.shape_cast %43 : vector<1x64x8xf32> to vector<64x8xf32>
    %cst_30 = arith.constant dense<0.000000e+00> : vector<64x224xf32>
    %45 = tpu.matmul %44, %42, %cst_30 {dimension_numbers = #tpu.dot_dimension_numbers<[1], [0], [0], [1], [0, 0, 1, 1], [], []>} : vector<64x8xf32>, vector<8x224xf32>, vector<64x224xf32> -> vector<64x224xf32>
    %46 = arith.addf %41, %45 : vector<64x224xf32>
    %47 = vector.broadcast %0 : vector<64x1xf32> to vector<64x224xf32>
    %48 = arith.addf %46, %47 : vector<64x224xf32>
    %c0_31 = arith.constant 0 : index
    %c0_32 = arith.constant 0 : index
    %c0_33 = arith.constant 0 : index
    %49 = vector.load %arg4[%c0_31, %c0_32, %c0_33] : memref<2x64x224xf32, #tpu.memory_space<vmem>>, vector<1x64x224xf32>
    %50 = vector.shape_cast %49 : vector<1x64x224xf32> to vector<64x224xf32>
    %51 = vector.shape_cast %48 : vector<64x224xf32> to vector<1x64x224xf32>
    tpu.vector_store %arg4[%c0_31, %c0_32, %c0_33], %51 {strides = array<i32>} : memref<2x64x224xf32, #tpu.memory_space<vmem>>, vector<1x64x224xf32>,
    %c1_34 = arith.constant 1 : index
    %c0_35 = arith.constant 0 : index
    %c0_36 = arith.constant 0 : index
    %52 = vector.load %arg1[%c1_34, %c0_35, %c0_36] : memref<2x8x384xf32, #tpu.memory_space<vmem>>, vector<1x8x384xf32>
    %53 = vector.shape_cast %52 : vector<1x8x384xf32> to vector<8x384xf32>
    %54 = vector.extract_strided_slice %53 {offsets = [0, 0], sizes = [8, 224], strides = [1, 1]} : vector<8x384xf32> to vector<8x224xf32>
    %c0_37 = arith.constant 0 : index
    %c0_38 = arith.constant 0 : index
    %c0_39 = arith.constant 0 : index
    %55 = vector.load %arg2[%c0_37, %c0_38, %c0_39] : memref<9x64x8xf32, #tpu.memory_space<vmem>>, vector<1x64x8xf32>
    %56 = vector.shape_cast %55 : vector<1x64x8xf32> to vector<64x8xf32>
    %cst_40 = arith.constant dense<0.000000e+00> : vector<64x224xf32>
    %57 = tpu.matmul %56, %54, %cst_40 {dimension_numbers = #tpu.dot_dimension_numbers<[1], [0], [0], [1], [0, 0, 1, 1], [], []>} : vector<64x8xf32>, vector<8x224xf32>, vector<64x224xf32> -> vector<64x224xf32>
    %58 = vector.extract_strided_slice %53 {offsets = [0, 1], sizes = [8, 224], strides = [1, 1]} : vector<8x384xf32> to vector<8x224xf32>
    %c1_41 = arith.constant 1 : index
    %c0_42 = arith.constant 0 : index
    %c0_43 = arith.constant 0 : index
    %59 = vector.load %arg2[%c1_41, %c0_42, %c0_43] : memref<9x64x8xf32, #tpu.memory_space<vmem>>, vector<1x64x8xf32>
    %60 = vector.shape_cast %59 : vector<1x64x8xf32> to vector<64x8xf32>
    %cst_44 = arith.constant dense<0.000000e+00> : vector<64x224xf32>
    %61 = tpu.matmul %60, %58, %cst_44 {dimension_numbers = #tpu.dot_dimension_numbers<[1], [0], [0], [1], [0, 0, 1, 1], [], []>} : vector<64x8xf32>, vector<8x224xf32>, vector<64x224xf32> -> vector<64x224xf32>
    %62 = arith.addf %57, %61 : vector<64x224xf32>
    %63 = vector.extract_strided_slice %53 {offsets = [0, 2], sizes = [8, 224], strides = [1, 1]} : vector<8x384xf32> to vector<8x224xf32>
    %c2_45 = arith.constant 2 : index
    %c0_46 = arith.constant 0 : index
    %c0_47 = arith.constant 0 : index
    %64 = vector.load %arg2[%c2_45, %c0_46, %c0_47] : memref<9x64x8xf32, #tpu.memory_space<vmem>>, vector<1x64x8xf32>
    %65 = vector.shape_cast %64 : vector<1x64x8xf32> to vector<64x8xf32>
    %cst_48 = arith.constant dense<0.000000e+00> : vector<64x224xf32>
    %66 = tpu.matmul %65, %63, %cst_48 {dimension_numbers = #tpu.dot_dimension_numbers<[1], [0], [0], [1], [0, 0, 1, 1], [], []>} : vector<64x8xf32>, vector<8x224xf32>, vector<64x224xf32> -> vector<64x224xf32>
    %67 = arith.addf %62, %66 : vector<64x224xf32>
    %68 = vector.extract_strided_slice %53 {offsets = [0, 16], sizes = [8, 224], strides = [1, 1]} : vector<8x384xf32> to vector<8x224xf32>
    %c3_49 = arith.constant 3 : index
    %c0_50 = arith.constant 0 : index
    %c0_51 = arith.constant 0 : index
    %69 = vector.load %arg2[%c3_49, %c0_50, %c0_51] : memref<9x64x8xf32, #tpu.memory_space<vmem>>, vector<1x64x8xf32>
    %70 = vector.shape_cast %69 : vector<1x64x8xf32> to vector<64x8xf32>
    %cst_52 = arith.constant dense<0.000000e+00> : vector<64x224xf32>
    %71 = tpu.matmul %70, %68, %cst_52 {dimension_numbers = #tpu.dot_dimension_numbers<[1], [0], [0], [1], [0, 0, 1, 1], [], []>} : vector<64x8xf32>, vector<8x224xf32>, vector<64x224xf32> -> vector<64x224xf32>
    %72 = arith.addf %67, %71 : vector<64x224xf32>
    %73 = vector.extract_strided_slice %53 {offsets = [0, 17], sizes = [8, 224], strides = [1, 1]} : vector<8x384xf32> to vector<8x224xf32>
    %c4_53 = arith.constant 4 : index
    %c0_54 = arith.constant 0 : index
    %c0_55 = arith.constant 0 : index
    %74 = vector.load %arg2[%c4_53, %c0_54, %c0_55] : memref<9x64x8xf32, #tpu.memory_space<vmem>>, vector<1x64x8xf32>
    %75 = vector.shape_cast %74 : vector<1x64x8xf32> to vector<64x8xf32>
    %cst_56 = arith.constant dense<0.000000e+00> : vector<64x224xf32>
    %76 = tpu.matmul %75, %73, %cst_56 {dimension_numbers = #tpu.dot_dimension_numbers<[1], [0], [0], [1], [0, 0, 1, 1], [], []>} : vector<64x8xf32>, vector<8x224xf32>, vector<64x224xf32> -> vector<64x224xf32>
    %77 = arith.addf %72, %76 : vector<64x224xf32>
    %78 = vector.extract_strided_slice %53 {offsets = [0, 18], sizes = [8, 224], strides = [1, 1]} : vector<8x384xf32> to vector<8x224xf32>
    %c5_57 = arith.constant 5 : index
    %c0_58 = arith.constant 0 : index
    %c0_59 = arith.constant 0 : index
    %79 = vector.load %arg2[%c5_57, %c0_58, %c0_59] : memref<9x64x8xf32, #tpu.memory_space<vmem>>, vector<1x64x8xf32>
    %80 = vector.shape_cast %79 : vector<1x64x8xf32> to vector<64x8xf32>
    %cst_60 = arith.constant dense<0.000000e+00> : vector<64x224xf32>
    %81 = tpu.matmul %80, %78, %cst_60 {dimension_numbers = #tpu.dot_dimension_numbers<[1], [0], [0], [1], [0, 0, 1, 1], [], []>} : vector<64x8xf32>, vector<8x224xf32>, vector<64x224xf32> -> vector<64x224xf32>
    %82 = arith.addf %77, %81 : vector<64x224xf32>
    %83 = vector.extract_strided_slice %53 {offsets = [0, 32], sizes = [8, 224], strides = [1, 1]} : vector<8x384xf32> to vector<8x224xf32>
    %c6_61 = arith.constant 6 : index
    %c0_62 = arith.constant 0 : index
    %c0_63 = arith.constant 0 : index
    %84 = vector.load %arg2[%c6_61, %c0_62, %c0_63] : memref<9x64x8xf32, #tpu.memory_space<vmem>>, vector<1x64x8xf32>
    %85 = vector.shape_cast %84 : vector<1x64x8xf32> to vector<64x8xf32>
    %cst_64 = arith.constant dense<0.000000e+00> : vector<64x224xf32>
    %86 = tpu.matmul %85, %83, %cst_64 {dimension_numbers = #tpu.dot_dimension_numbers<[1], [0], [0], [1], [0, 0, 1, 1], [], []>} : vector<64x8xf32>, vector<8x224xf32>, vector<64x224xf32> -> vector<64x224xf32>
    %87 = arith.addf %82, %86 : vector<64x224xf32>
    %88 = vector.extract_strided_slice %53 {offsets = [0, 33], sizes = [8, 224], strides = [1, 1]} : vector<8x384xf32> to vector<8x224xf32>
    %c7_65 = arith.constant 7 : index
    %c0_66 = arith.constant 0 : index
    %c0_67 = arith.constant 0 : index
    %89 = vector.load %arg2[%c7_65, %c0_66, %c0_67] : memref<9x64x8xf32, #tpu.memory_space<vmem>>, vector<1x64x8xf32>
    %90 = vector.shape_cast %89 : vector<1x64x8xf32> to vector<64x8xf32>
    %cst_68 = arith.constant dense<0.000000e+00> : vector<64x224xf32>
    %91 = tpu.matmul %90, %88, %cst_68 {dimension_numbers = #tpu.dot_dimension_numbers<[1], [0], [0], [1], [0, 0, 1, 1], [], []>} : vector<64x8xf32>, vector<8x224xf32>, vector<64x224xf32> -> vector<64x224xf32>
    %92 = arith.addf %87, %91 : vector<64x224xf32>
    %93 = vector.extract_strided_slice %53 {offsets = [0, 34], sizes = [8, 224], strides = [1, 1]} : vector<8x384xf32> to vector<8x224xf32>
    %c8_69 = arith.constant 8 : index
    %c0_70 = arith.constant 0 : index
    %c0_71 = arith.constant 0 : index
    %94 = vector.load %arg2[%c8_69, %c0_70, %c0_71] : memref<9x64x8xf32, #tpu.memory_space<vmem>>, vector<1x64x8xf32>
    %95 = vector.shape_cast %94 : vector<1x64x8xf32> to vector<64x8xf32>
    %cst_72 = arith.constant dense<0.000000e+00> : vector<64x224xf32>
    %96 = tpu.matmul %95, %93, %cst_72 {dimension_numbers = #tpu.dot_dimension_numbers<[1], [0], [0], [1], [0, 0, 1, 1], [], []>} : vector<64x8xf32>, vector<8x224xf32>, vector<64x224xf32> -> vector<64x224xf32>
    %97 = arith.addf %92, %96 : vector<64x224xf32>
    %98 = vector.broadcast %0 : vector<64x1xf32> to vector<64x224xf32>
    %99 = arith.addf %97, %98 : vector<64x224xf32>
    %c1_73 = arith.constant 1 : index
    %c0_74 = arith.constant 0 : index
    %c0_75 = arith.constant 0 : index
    %100 = vector.load %arg4[%c1_73, %c0_74, %c0_75] : memref<2x64x224xf32, #tpu.memory_space<vmem>>, vector<1x64x224xf32>
    %101 = vector.shape_cast %100 : vector<1x64x224xf32> to vector<64x224xf32>
    %102 = vector.shape_cast %99 : vector<64x224xf32> to vector<1x64x224xf32>
    tpu.vector_store %arg4[%c1_73, %c0_74, %c0_75], %102 {strides = array<i32>} : memref<2x64x224xf32, #tpu.memory_space<vmem>>, vector<1x64x224xf32>,
    return
  }
  func.func @transform_0(%arg0: i32) -> (i32, i32, i32) {
    %c0_i32 = arith.constant 0 : i32
    %c0_i32_0 = arith.constant 0 : i32
    %c0_i32_1 = arith.constant 0 : i32
    return %arg0, %c0_i32, %c0_i32_0 : i32, i32, i32
  }
  func.func @transform_1(%arg0: i32) -> (i32, i32, i32) {
    %c0_i32 = arith.constant 0 : i32
    %c0_i32_0 = arith.constant 0 : i32
    %c0_i32_1 = arith.constant 0 : i32
    %c0_i32_2 = arith.constant 0 : i32
    return %c0_i32, %c0_i32_0, %c0_i32_1 : i32, i32, i32
  }
  func.func @transform_2(%arg0: i32) -> (i32, i32) {
    %c0_i32 = arith.constant 0 : i32
    %c0_i32_0 = arith.constant 0 : i32
    %c0_i32_1 = arith.constant 0 : i32
    return %c0_i32, %c0_i32_0 : i32, i32
  }
  func.func @transform_3(%arg0: i32) -> (i32, i32, i32) {
    %c0_i32 = arith.constant 0 : i32
    %c0_i32_0 = arith.constant 0 : i32
    %c0_i32_1 = arith.constant 0 : i32
    return %arg0, %c0_i32, %c0_i32_0 : i32, i32, i32
  }
}

</mosaic_0001>

<bundles_post_ra>
// kernel: tpu_custom_call.1
= control target key start
LH: loop header
LB: loop body
LE: loop exit
PB: predicated region body
PF: predicated region fallthrough
CT: control target
= control target key end

     0   :  { %s3702_s16 = smov 127   ;;  %v3703_v4 = vmov 0.0   ;;  %s4360_s0 = inlined_call_operand.vmem [shape: f32[2,8,384], index: 0, kind: input, shape index: {}]   ;;  %s4361_s1 = inlined_call_operand.vmem [shape: f32[9,64,8], index: 1, kind: input, shape index: {}]   ;;  %s4362_s2 = inlined_call_operand.vmem [shape: f32[64,1], index: 2, kind: input, shape index: {}]   ;;  %s4363_s3 = inlined_call_operand.hbm [shape: f32[2,64,224], index: 3, kind: output, shape index: {}]  }
   0x1   :  { %v3738_v0 = vld [vmem:[%s4360_s0 + $0x18] sm:$0xff]  ;;  %v3743_v1 = vld [vmem:[%s4360_s0] sm:$0xff]  ;;  %v24_v3 = vld [vmem:[%s4360_s0 + $0x8] sm:$0xff]  ;;  %142 = vmatprep.mubr.f32.mxu0 %v3703_v4  ;;  %1714 = vmatprep.mubr.f32.mxu1 %v3703_v4 }
   0x2   :  { %1619 = vrot.lane.b32.xlu1 %v3738_v0, %s3702_s16  ;;  %45 = vrot.lane.b32.xlu0 %v3743_v1, %s3702_s16  ;;  %v3750_v2 = vld [vmem:[%s4360_s0 + $0x20] sm:$0xff] }
   0x3   :  { %8 = vsyncpa [#allocation3], 0  ;;  %s3704_s21 = smov 126   ;;  %s3705_s22 = smov 112   ;;  %v25_v5 = vld [vmem:[%s4360_s0 + $0x10] sm:$0xff]  ;;  %v3270_v6 = vld [vmem:[%s4360_s0 + $0x28] sm:$0xff] }
   0x4   :  { %s3706_s23 = smov 111   ;;  %s3707_s24 = smov 110   ;;  %vm49_vm0 = vcmask 1039360   ;;  %v3132_v11 = vld [vmem:[%s4361_s1 + $0x40] sm:$0xff]  ;;  %vm53_vm1 = vcmask 64512   ;;  %v3133_v14 = vld [vmem:[%s4361_s1 + $0x48] sm:$0xff] }
   0x5   :  { %s3708_s25 = smov 96   ;;  %s3709_s26 = smov 95   ;;  %v3134_v16 = vld [vmem:[%s4361_s1 + $0x50] sm:$0xff]  ;;  %v3135_v18 = vld [vmem:[%s4361_s1 + $0x58] sm:$0xff]  ;;  %v3136_v19 = vld [vmem:[%s4361_s1 + $0x60] sm:$0xff]  ;;  %vm341_vm2 = vcmask 1031168  }
   0x6   :  { %1621 = vrot.lane.b32.xlu1 %v3750_v2, %s3702_s16  ;;  %47 = vrot.lane.b32.xlu0 %v24_v3, %s3702_s16  ;;  %s3710_s4 = smov 94   ;;  %v3137_v20 = vld [vmem:[%s4361_s1 + $0x68] sm:$0xff]  ;;  %v3138_v21 = vld [vmem:[%s4361_s1 + $0x70] sm:$0xff]  ;;  %vm511_vm3 = vcmask 916480   ;;  %vm681_vm4 = vcmask 908288   ;;  %vm851_vm5 = vcmask 900096  }
   0x7   :  { %v3139_v23 = vld [vmem:[%s4361_s1 + $0x78] sm:$0xff]  ;;  %v26_v26 = vld [vmem:[%s4361_s1] sm:$0xff]  ;;  %v27_v29 = vld [vmem:[%s4361_s1 + $0x8] sm:$0xff]  ;;  %vm1021_vm6 = vcmask 785408   ;;  %vm1194_vm7 = vcmask 777216   ;;  %vm1367_vm8 = vcmask 769024  }
   0x8   :  { %v28_v31 = vld [vmem:[%s4361_s1 + $0x10] sm:$0xff]  ;;  %v29_v32 = vld [vmem:[%s4361_s1 + $0x18] sm:$0xff]  ;;  %v30_v33 = vld [vmem:[%s4361_s1 + $0x20] sm:$0xff] }
   0x9   :  { %v31_v34 = vld [vmem:[%s4361_s1 + $0x28] sm:$0xff]  ;;  %v32_v35 = vld [vmem:[%s4361_s1 + $0x30] sm:$0xff]  ;;  %v33_v37 = vld [vmem:[%s4361_s1 + $0x38] sm:$0xff] }
   0xa   :  { %339 = vrot.lane.b32.xlu1 %v24_v3, %s3704_s21  ;;  %337 = vrot.lane.b32.xlu0 %v3743_v1, %s3704_s21  ;;  %v3156_v40 = vld [vmem:[%s4361_s1 + $0x80] sm:$0xff]  ;;  %v3157_v43 = vld [vmem:[%s4361_s1 + $0x88] sm:$0xff] }
   0xb   :  { %v3158_v45 = vld [vmem:[%s4361_s1 + $0x90] sm:$0xff]  ;;  %v3159_v46 = vld [vmem:[%s4361_s1 + $0x98] sm:$0xff]  ;;  %v3160_v47 = vld [vmem:[%s4361_s1 + $0xa0] sm:$0xff] }
   0xc   :  { %v3161_v48 = vld [vmem:[%s4361_s1 + $0xa8] sm:$0xff]  ;;  %v3162_v49 = vld [vmem:[%s4361_s1 + $0xb0] sm:$0xff]  ;;  %v3163_v51 = vld [vmem:[%s4361_s1 + $0xb8] sm:$0xff] }
   0xd   :  { %v3172_v54 = vld [vmem:[%s4361_s1 + $0xc0] sm:$0xff]  ;;  %v3173_v57 = vld [vmem:[%s4361_s1 + $0xc8] sm:$0xff]  ;;  %v3174_v59 = vld [vmem:[%s4361_s1 + $0xd0] sm:$0xff] }
   0xe   :  { %1910 = vrot.lane.b32.xlu1 %v3750_v2, %s3704_s21  ;;  %1908 = vrot.lane.b32.xlu0 %v3738_v0, %s3704_s21  ;;  %v3175_v60 = vld [vmem:[%s4361_s1 + $0xd8] sm:$0xff]  ;;  %v3176_v61 = vld [vmem:[%s4361_s1 + $0xe0] sm:$0xff] }
   0xf   :  { %v3177_v62 = vld [vmem:[%s4361_s1 + $0xe8] sm:$0xff]  ;;  %v3178_v63 = vld [vmem:[%s4361_s1 + $0xf0] sm:$0xff] }
  0x12   :  { %509 = vrot.lane.b32.xlu1 %v24_v3, %s3705_s22  ;;  %507 = vrot.lane.b32.xlu0 %v3743_v1, %s3705_s22 }
  0x16   :  { %2078 = vrot.lane.b32.xlu1 %v3750_v2, %s3705_s22  ;;  %2076 = vrot.lane.b32.xlu0 %v3738_v0, %s3705_s22 }
  0x1a   :  { %679 = vrot.lane.b32.xlu1 %v24_v3, %s3706_s23  ;;  %677 = vrot.lane.b32.xlu0 %v3743_v1, %s3706_s23 }
  0x1e   :  { %2246 = vrot.lane.b32.xlu1 %v3750_v2, %s3706_s23  ;;  %2244 = vrot.lane.b32.xlu0 %v3738_v0, %s3706_s23 }
  0x22   :  { %849 = vrot.lane.b32.xlu1 %v24_v3, %s3707_s24  ;;  %847 = vrot.lane.b32.xlu0 %v3743_v1, %s3707_s24 }
  0x26   :  { %2414 = vrot.lane.b32.xlu1 %v3750_v2, %s3707_s24  ;;  %2412 = vrot.lane.b32.xlu0 %v3738_v0, %s3707_s24 }
  0x2a   :  { %1019 = vrot.lane.b32.xlu1 %v24_v3, %s3708_s25  ;;  %1017 = vrot.lane.b32.xlu0 %v3743_v1, %s3708_s25 }
  0x2e   :  { %2582 = vrot.lane.b32.xlu1 %v3750_v2, %s3708_s25  ;;  %2580 = vrot.lane.b32.xlu0 %v3738_v0, %s3708_s25 }
  0x32   :  { %1190 = vrot.lane.b32.xlu0 %v24_v3, %s3709_s26  ;;  %1192 = vrot.lane.b32.xlu1 %v25_v5, %s3709_s26 }
  0x36   :  { %2751 = vrot.lane.b32.xlu0 %v3750_v2, %s3709_s26  ;;  %2753 = vrot.lane.b32.xlu1 %v3270_v6, %s3709_s26 }
  0x3a   :  { %1188 = vrot.lane.b32.xlu0 %v3743_v1, %s3709_s26  ;;  %2749 = vrot.lane.b32.xlu1 %v3738_v0, %s3709_s26 }
  0x3e   :  { %1363 = vrot.lane.b32.xlu0 %v24_v3, %s3710_s4  ;;  %1365 = vrot.lane.b32.xlu1 %v25_v5, %s3710_s4  ;;  %v3188_v5 = vld [vmem:[%s4361_s1 + $0x100] sm:$0xff] }
  0x42   :  { %2922 = vrot.lane.b32.xlu0 %v3750_v2, %s3710_s4  ;;  %2924 = vrot.lane.b32.xlu1 %v3270_v6, %s3710_s4 }
  0x46   :  { %1361 = vrot.lane.b32.xlu0 %v3743_v1, %s3710_s4  ;;  %2920 = vrot.lane.b32.xlu1 %v3738_v0, %s3710_s4 }
  0x74   :  { %v1620_v7 = vpop.permute.xlu1 %1619  ;;  %v46_v8 = vpop.permute.xlu0 %45 }
  0x78   :  { %v1622_v9 = vpop.permute.xlu1 %1621  ;;  %v48_v10 = vpop.permute.xlu0 %47 }
  0x79   :  { %78 = vmatprep.subr.mxu0 %v48_v10  ;;  %1650 = vmatprep.subr.mxu1 %v1622_v9  ;;  %v50_v12 = vsel %vm49_vm0, %v46_v8, %v48_v10  ;;  %v1623_v13 = vsel %vm49_vm0, %v1620_v7, %v1622_v9  ;;  %v3189_v8 = vld [vmem:[%s4361_s1 + $0x108] sm:$0xff]  ;;  %v3190_v10 = vld [vmem:[%s4361_s1 + $0x110] sm:$0xff] }
  0x7a   :  { %79 = vmatpush1.msra.mxu0 %v50_v12  ;;  %1651 = vmatpush1.msra.mxu1 %v1623_v13  ;;  %v3192_v12 = vld [vmem:[%s4361_s1 + $0x120] sm:$0xff] }
  0x7b   :  { %3140 = vmatmul.mubr.msk.f32.vlgmr.msra.gmra.mrb[0].mxu0 %vm53_vm1, %v3132_v11  ;;  %215 = vmatprep.subr.mxu0 %v24_v3 }
  0x7c   :  { %3279 = vmatmul.mubr.msk.f32.vlgmr.msra.gmra.mrb[0].mxu1 %vm53_vm1, %v3132_v11  ;;  %1787 = vmatprep.subr.mxu1 %v3750_v2  ;;  %v340_v15 = vpop.permute.xlu1 %339  ;;  %v338_v22 = vpop.permute.xlu0 %337  ;;  %v3191_v11 = vld [vmem:[%s4361_s1 + $0x118] sm:$0xff] }
  0x7d   :  { %216 = vmatpush1.msra.mxu0 %v3743_v1  ;;  %1788 = vmatpush1.msra.mxu1 %v3738_v0  ;;  %v342_v27 = vsel %vm341_vm2, %v338_v22, %v340_v15  ;;  %v3179_v1 = vld [vmem:[%s4361_s1 + $0xf8] sm:$0xff]  ;;  %v16_v22 = vld [vmem:[%s4362_s2 + $0x8] sm:$0xff] }
  0x7e   :  { %148 = vmatprep.mubr.f32.mxu0 %v3703_v4  ;;  %1720 = vmatprep.mubr.f32.mxu1 %v3703_v4 }
  0x7f   :  { %3141 = vmatmul.mubr.msk.f32.gmra.mrb[2].mxu0 %vm53_vm1, %v3133_v14  ;;  %369 = vmatprep.subr.mxu0 %v340_v15  ;;  %v3194_v15 = vld [vmem:[%s4361_s1 + $0x130] sm:$0xff] }
  0x80   :  { %3280 = vmatmul.mubr.msk.f32.gmra.mrb[2].mxu1 %vm53_vm1, %v3133_v14  ;;  %154 = vmatprep.mubr.f32.mxu0 %v3703_v4  ;;  %v1911_v17 = vpop.permute.xlu1 %1910  ;;  %v1909_v25 = vpop.permute.xlu0 %1908  ;;  %v3193_v14 = vld [vmem:[%s4361_s1 + $0x128] sm:$0xff] }
  0x81   :  { %1726 = vmatprep.mubr.f32.mxu1 %v3703_v4  ;;  %1939 = vmatprep.subr.mxu1 %v1911_v17  ;;  %v1912_v28 = vsel %vm341_vm2, %v1909_v25, %v1911_v17  ;;  %v3195_v17 = vld [vmem:[%s4361_s1 + $0x138] sm:$0xff] }
  0x83   :  { %3142 = vmatmul.mubr.msk.f32.gmra.mrb[4].mxu0 %vm53_vm1, %v3134_v16 }
  0x84   :  { %3281 = vmatmul.mubr.msk.f32.gmra.mrb[4].mxu1 %vm53_vm1, %v3134_v16  ;;  %160 = vmatprep.mubr.f32.mxu0 %v3703_v4  ;;  %v510_v24 = vpop.permute.xlu1 %509  ;;  %v508_v36 = vpop.permute.xlu0 %507 }
  0x85   :  { %1732 = vmatprep.mubr.f32.mxu1 %v3703_v4  ;;  %v512_v41 = vsel %vm511_vm3, %v508_v36, %v510_v24  ;;  %v3207_v36 = vld [vmem:[%s4361_s1 + $0x158] sm:$0xff] }
  0x87   :  { %3143 = vmatmul.mubr.msk.f32.gmra.mrb[6].mxu0 %vm53_vm1, %v3135_v18 }
  0x88   :  { %3282 = vmatmul.mubr.msk.f32.gmra.mrb[6].mxu1 %vm53_vm1, %v3135_v18  ;;  %166 = vmatprep.mubr.f32.mxu0 %v3703_v4  ;;  %v2079_v30 = vpop.permute.xlu1 %2078  ;;  %v2077_v39 = vpop.permute.xlu0 %2076 }
  0x89   :  { %1738 = vmatprep.mubr.f32.mxu1 %v3703_v4  ;;  %v2080_v42 = vsel %vm511_vm3, %v2077_v39, %v2079_v30  ;;  %v3208_v39 = vld [vmem:[%s4361_s1 + $0x160] sm:$0xff] }
  0x8b   :  { %3144 = vmatmul.mubr.msk.f32.gmra.mrb[8].mxu0 %vm53_vm1, %v3136_v19 }
  0x8c   :  { %3283 = vmatmul.mubr.msk.f32.gmra.mrb[8].mxu1 %vm53_vm1, %v3136_v19  ;;  %172 = vmatprep.mubr.f32.mxu0 %v3703_v4  ;;  %v680_v38 = vpop.permute.xlu1 %679  ;;  %v678_v50 = vpop.permute.xlu0 %677 }
  0x8d   :  { %1744 = vmatprep.mubr.f32.mxu1 %v3703_v4  ;;  %v682_v55 = vsel %vm681_vm4, %v678_v50, %v680_v38 }
  0x8f   :  { %3145 = vmatmul.mubr.msk.f32.gmra.mrb[10].mxu0 %vm53_vm1, %v3137_v20 }
  0x90   :  { %3284 = vmatmul.mubr.msk.f32.gmra.mrb[10].mxu1 %vm53_vm1, %v3137_v20  ;;  %178 = vmatprep.mubr.f32.mxu0 %v3703_v4  ;;  %v2247_v44 = vpop.permute.xlu1 %2246  ;;  %v2245_v53 = vpop.permute.xlu0 %2244  ;;  %v3204_v20 = vld [vmem:[%s4361_s1 + $0x140] sm:$0xff] }
  0x91   :  { %1750 = vmatprep.mubr.f32.mxu1 %v3703_v4  ;;  %v2248_v56 = vsel %vm681_vm4, %v2245_v53, %v2247_v44  ;;  %v3221_v53 = vld [vmem:[%s4361_s1 + $0x188] sm:$0xff] }
  0x93   :  { %3146 = vmatmul.mubr.msk.f32.gmra.mrb[12].mxu0 %vm53_vm1, %v3138_v21 }
  0x94   :  { %3285 = vmatmul.mubr.msk.f32.gmra.mrb[12].mxu1 %vm53_vm1, %v3138_v21  ;;  %184 = vmatprep.mubr.f32.mxu0 %v3703_v4  ;;  %v850_v52 = vpop.permute.xlu1 %849  ;;  %v848_v0 = vpop.permute.xlu0 %847  ;;  %v15_v21 = vld [vmem:[%s4362_s2] sm:$0xff] }
  0x95   :  { %1756 = vmatprep.mubr.f32.mxu1 %v3703_v4  ;;  %v852_v6 = vsel %vm851_vm5, %v848_v0, %v850_v52 }
  0x97   :  { %3147 = vmatmul.mubr.msk.f32.gmra.mrb[14].mxu0 %vm53_vm1, %v3139_v23 }
  0x98   :  { %3286 = vmatmul.mubr.msk.f32.gmra.mrb[14].mxu1 %vm53_vm1, %v3139_v23  ;;  %279 = vmatprep.mubr.f32.mxu0 %v3703_v4  ;;  %v2415_v58 = vpop.permute.xlu1 %2414  ;;  %v2413_v3 = vpop.permute.xlu0 %2412 }
  0x99   :  { %1851 = vmatprep.mubr.f32.mxu1 %v3703_v4  ;;  %v2416_v7 = vsel %vm851_vm5, %v2413_v3, %v2415_v58  ;;  %v3238_v3 = vld [vmem:[%s4361_s1 + $0x1d0] sm:$0xff] }
  0x9b   :  { %3148 = vmatmul.mubr.msk.f32.vlgmr.msra.gmra.mrb[0].mxu0 %vm53_vm1, %v26_v26 }
  0x9c   :  { %370 = vmatpush1.msra.mxu0 %v342_v27  ;;  %3287 = vmatmul.mubr.msk.f32.vlgmr.msra.gmra.mrb[0].mxu1 %vm53_vm1, %v26_v26  ;;  %v1020_v2 = vpop.permute.xlu1 %1019  ;;  %v1018_v13 = vpop.permute.xlu0 %1017 }
  0x9d   :  { %1940 = vmatpush1.msra.mxu1 %v1912_v28  ;;  %285 = vmatprep.mubr.f32.mxu0 %v3703_v4  ;;  %v1022_v23 = vsel %vm1021_vm6, %v1018_v13, %v1020_v2  ;;  %v3255_v13 = vld [vmem:[%s4361_s1 + $0x218] sm:$0xff] }
  0x9e   :  { %1857 = vmatprep.mubr.f32.mxu1 %v3703_v4  ;;  %539 = vmatprep.subr.mxu0 %v510_v24  ;;  %v3711_v24 = vmov 0  }
  0x9f   :  { %3149 = vmatmul.mubr.msk.f32.gmra.mrb[2].mxu0 %vm53_vm1, %v27_v29  ;;  %2107 = vmatprep.subr.mxu1 %v2079_v30 }
  0xa0   :  { %3288 = vmatmul.mubr.msk.f32.gmra.mrb[2].mxu1 %vm53_vm1, %v27_v29  ;;  %291 = vmatprep.mubr.f32.mxu0 %v3703_v4  ;;  %v2583_v9 = vpop.permute.xlu1 %2582  ;;  %v2581_v16 = vpop.permute.xlu0 %2580  ;;  %v3205_v29 = vld [vmem:[%s4361_s1 + $0x148] sm:$0xff] }
  0xa1   :  { %1863 = vmatprep.mubr.f32.mxu1 %v3703_v4  ;;  %3676 = vset.pattern.permute.xlu0 %v3711_v24  ;;  %v2584_v25 = vsel %vm1021_vm6, %v2581_v16, %v2583_v9  ;;  %v3258_v16 = vld [vmem:[%s4361_s1 + $0x230] sm:$0xff] }
  0xa2   :  { %1527 = vperm.xlu0 %3676, %v15_v21   ;;  %3677 = vset.pattern.permute.xlu1 %v3711_v24 }
  0xa3   :  { %3150 = vmatmul.mubr.msk.f32.gmra.mrb[4].mxu0 %vm53_vm1, %v28_v31  ;;  %1532 = vperm.xlu1 %3677, %v16_v22  }
  0xa4   :  { %3289 = vmatmul.mubr.msk.f32.gmra.mrb[4].mxu1 %vm53_vm1, %v28_v31  ;;  %297 = vmatprep.mubr.f32.mxu0 %v3703_v4  ;;  %v4064_v18 = vpop.permute.xlu0 %1190  ;;  %v1193_v19 = vpop.permute.xlu1 %1192  ;;  %v17_v31 = vld [vmem:[%s4362_s2 + $0x10] sm:$0xff] }
  0xa5   :  { %1869 = vmatprep.mubr.f32.mxu1 %v3703_v4  ;;  %v1196_v28 = vsel %vm1194_vm7, %v4064_v18, %v1193_v19 }
  0xa7   :  { %3151 = vmatmul.mubr.msk.f32.gmra.mrb[6].mxu0 %vm53_vm1, %v29_v32  ;;  %1537 = vperm.xlu1 %3677, %v17_v31  }
  0xa8   :  { %3290 = vmatmul.mubr.msk.f32.gmra.mrb[6].mxu1 %vm53_vm1, %v29_v32  ;;  %303 = vmatprep.mubr.f32.mxu0 %v3703_v4  ;;  %v4082_v26 = vpop.permute.xlu0 %2751  ;;  %v2754_v27 = vpop.permute.xlu1 %2753  ;;  %v18_v32 = vld [vmem:[%s4362_s2 + $0x18] sm:$0xff] }
  0xa9   :  { %1875 = vmatprep.mubr.f32.mxu1 %v3703_v4  ;;  %v2756_v30 = vsel %vm1194_vm7, %v4082_v26, %v2754_v27  ;;  %1542 = vperm.xlu0 %3676, %v18_v32  }
  0xab   :  { %3152 = vmatmul.mubr.msk.f32.gmra.mrb[8].mxu0 %vm53_vm1, %v30_v33 }
  0xac   :  { %3291 = vmatmul.mubr.msk.f32.gmra.mrb[8].mxu1 %vm53_vm1, %v30_v33  ;;  %309 = vmatprep.mubr.f32.mxu0 %v3703_v4  ;;  %v3206_v33 = vld [vmem:[%s4361_s1 + $0x150] sm:$0xff] }
  0xad   :  { %1881 = vmatprep.mubr.f32.mxu1 %v3703_v4 }
  0xaf   :  { %3153 = vmatmul.mubr.msk.f32.gmra.mrb[10].mxu0 %vm53_vm1, %v31_v34 }
  0xb0   :  { %3292 = vmatmul.mubr.msk.f32.gmra.mrb[10].mxu1 %vm53_vm1, %v31_v34  ;;  %315 = vmatprep.mubr.f32.mxu0 %v3703_v4  ;;  %v19_v34 = vld [vmem:[%s4362_s2 + $0x20] sm:$0xff] }
  0xb1   :  { %1887 = vmatprep.mubr.f32.mxu1 %v3703_v4  ;;  %1547 = vperm.xlu1 %3677, %v19_v34  }
  0xb3   :  { %3154 = vmatmul.mubr.msk.f32.gmra.mrb[12].mxu0 %vm53_vm1, %v32_v35 }
  0xb4   :  { %3293 = vmatmul.mubr.msk.f32.gmra.mrb[12].mxu1 %vm53_vm1, %v32_v35  ;;  %321 = vmatprep.mubr.f32.mxu0 %v3703_v4  ;;  %v20_v35 = vld [vmem:[%s4362_s2 + $0x28] sm:$0xff] }
  0xb5   :  { %1893 = vmatprep.mubr.f32.mxu1 %v3703_v4  ;;  %1552 = vperm.xlu0 %3676, %v20_v35  }
  0xb7   :  { %3155 = vmatmul.mubr.msk.f32.gmra.mrb[14].mxu0 %vm53_vm1, %v33_v37 }
  0xb8   :  { %3294 = vmatmul.mubr.msk.f32.gmra.mrb[14].mxu1 %vm53_vm1, %v33_v37  ;;  %433 = vmatprep.mubr.f32.mxu0 %v3703_v4  ;;  %v21_v37 = vld [vmem:[%s4362_s2 + $0x30] sm:$0xff] }
  0xb9   :  { %2003 = vmatprep.mubr.f32.mxu1 %v3703_v4  ;;  %1557 = vperm.xlu1 %3677, %v21_v37  }
  0xbb   :  { %3164 = vmatmul.mubr.msk.f32.vlgmr.msra.gmra.mrb[0].mxu0 %vm53_vm1, %v3156_v40 }
  0xbc   :  { %540 = vmatpush1.msra.mxu0 %v512_v41  ;;  %3303 = vmatmul.mubr.msk.f32.vlgmr.msra.gmra.mrb[0].mxu1 %vm53_vm1, %v3156_v40  ;;  %v3209_v40 = vld [vmem:[%s4361_s1 + $0x168] sm:$0xff]  ;;  %v3210_v41 = vld [vmem:[%s4361_s1 + $0x170] sm:$0xff] }
  0xbd   :  { %2108 = vmatpush1.msra.mxu1 %v2080_v42  ;;  %439 = vmatprep.mubr.f32.mxu0 %v3703_v4  ;;  %v1189_v42 = vpop.permute.xlu0 %1188 }
  0xbe   :  { %2009 = vmatprep.mubr.f32.mxu1 %v3703_v4  ;;  %709 = vmatprep.subr.mxu0 %v680_v38  ;;  %v22_v38 = vld [vmem:[%s4362_s2 + $0x38] sm:$0xff] }
  0xbf   :  { %3165 = vmatmul.mubr.msk.f32.gmra.mrb[2].mxu0 %vm53_vm1, %v3157_v43  ;;  %2275 = vmatprep.subr.mxu1 %v2247_v44  ;;  %v3211_v44 = vld [vmem:[%s4361_s1 + $0x178] sm:$0xff] }
  0xc0   :  { %3304 = vmatmul.mubr.msk.f32.gmra.mrb[2].mxu1 %vm53_vm1, %v3157_v43  ;;  %445 = vmatprep.mubr.f32.mxu0 %v3703_v4  ;;  %v2750_v43 = vpop.permute.xlu1 %2749 }
  0xc1   :  { %2015 = vmatprep.mubr.f32.mxu1 %v3703_v4  ;;  %1562 = vperm.xlu0 %3676, %v22_v38  }
  0xc3   :  { %3166 = vmatmul.mubr.msk.f32.gmra.mrb[4].mxu0 %vm53_vm1, %v3158_v45 }
  0xc4   :  { %3305 = vmatmul.mubr.msk.f32.gmra.mrb[4].mxu1 %vm53_vm1, %v3158_v45  ;;  %451 = vmatprep.mubr.f32.mxu0 %v3703_v4  ;;  %v1364_v45 = vpop.permute.xlu0 %1363 }
  0xc5   :  { %2021 = vmatprep.mubr.f32.mxu1 %v3703_v4 }
  0xc7   :  { %3167 = vmatmul.mubr.msk.f32.gmra.mrb[6].mxu0 %vm53_vm1, %v3159_v46 }
  0xc8   :  { %3306 = vmatmul.mubr.msk.f32.gmra.mrb[6].mxu1 %vm53_vm1, %v3159_v46  ;;  %457 = vmatprep.mubr.f32.mxu0 %v3703_v4  ;;  %v1366_v46 = vpop.permute.xlu1 %1365  ;;  %v2923_v50 = vpop.permute.xlu0 %2922 }
  0xc9   :  { %2027 = vmatprep.mubr.f32.mxu1 %v3703_v4 }
  0xcb   :  { %3168 = vmatmul.mubr.msk.f32.gmra.mrb[8].mxu0 %vm53_vm1, %v3160_v47 }
  0xcc   :  { %3307 = vmatmul.mubr.msk.f32.gmra.mrb[8].mxu1 %vm53_vm1, %v3160_v47  ;;  %463 = vmatprep.mubr.f32.mxu0 %v3703_v4  ;;  %v3220_v47 = vld [vmem:[%s4361_s1 + $0x180] sm:$0xff] }
  0xcd   :  { %2033 = vmatprep.mubr.f32.mxu1 %v3703_v4 }
  0xcf   :  { %3169 = vmatmul.mubr.msk.f32.gmra.mrb[10].mxu0 %vm53_vm1, %v3161_v48 }
  0xd0   :  { %3308 = vmatmul.mubr.msk.f32.gmra.mrb[10].mxu1 %vm53_vm1, %v3161_v48  ;;  %469 = vmatprep.mubr.f32.mxu0 %v3703_v4  ;;  %v1195_v48 = vsel %vm1194_vm7, %v1189_v42, %v4064_v18 }
  0xd1   :  { %2039 = vmatprep.mubr.f32.mxu1 %v3703_v4 }
  0xd3   :  { %3170 = vmatmul.mubr.msk.f32.gmra.mrb[12].mxu0 %vm53_vm1, %v3162_v49 }
  0xd4   :  { %3309 = vmatmul.mubr.msk.f32.gmra.mrb[12].mxu1 %vm53_vm1, %v3162_v49  ;;  %475 = vmatprep.mubr.f32.mxu0 %v3703_v4  ;;  %v2755_v49 = vsel %vm1194_vm7, %v2750_v43, %v4082_v26 }
  0xd5   :  { %2045 = vmatprep.mubr.f32.mxu1 %v3703_v4 }
  0xd7   :  { %3171 = vmatmul.mubr.msk.f32.gmra.mrb[14].mxu0 %vm53_vm1, %v3163_v51 }
  0xd8   :  { %3310 = vmatmul.mubr.msk.f32.gmra.mrb[14].mxu1 %vm53_vm1, %v3163_v51  ;;  %603 = vmatprep.mubr.f32.mxu0 %v3703_v4  ;;  %v2925_v51 = vpop.permute.xlu1 %2924 }
  0xd9   :  { %2171 = vmatprep.mubr.f32.mxu1 %v3703_v4 }
  0xdb   :  { %3180 = vmatmul.mubr.msk.f32.vlgmr.msra.gmra.mrb[0].mxu0 %vm53_vm1, %v3172_v54 }
  0xdc   :  { %710 = vmatpush1.msra.mxu0 %v682_v55  ;;  %3319 = vmatmul.mubr.msk.f32.vlgmr.msra.gmra.mrb[0].mxu1 %vm53_vm1, %v3172_v54  ;;  %v2927_v54 = vsel %vm1367_vm8, %v2923_v50, %v2925_v51  ;;  %v3222_v55 = vld [vmem:[%s4361_s1 + $0x190] sm:$0xff] }
  0xdd   :  { %2276 = vmatpush1.msra.mxu1 %v2248_v56  ;;  %609 = vmatprep.mubr.f32.mxu0 %v3703_v4  ;;  %v3223_v56 = vld [vmem:[%s4361_s1 + $0x198] sm:$0xff] }
  0xde   :  { %2177 = vmatprep.mubr.f32.mxu1 %v3703_v4  ;;  %879 = vmatprep.subr.mxu0 %v850_v52  ;;  %v1369_v52 = vsel %vm1367_vm8, %v1364_v45, %v1366_v46 }
  0xdf   :  { %3181 = vmatmul.mubr.msk.f32.gmra.mrb[2].mxu0 %vm53_vm1, %v3173_v57  ;;  %2443 = vmatprep.subr.mxu1 %v2415_v58  ;;  %v3225_v58 = vld [vmem:[%s4361_s1 + $0x1a8] sm:$0xff] }
  0xe0   :  { %3320 = vmatmul.mubr.msk.f32.gmra.mrb[2].mxu1 %vm53_vm1, %v3173_v57  ;;  %615 = vmatprep.mubr.f32.mxu0 %v3703_v4  ;;  %v3224_v57 = vld [vmem:[%s4361_s1 + $0x1a0] sm:$0xff] }
  0xe1   :  { %2183 = vmatprep.mubr.f32.mxu1 %v3703_v4 }
  0xe3   :  { %3182 = vmatmul.mubr.msk.f32.gmra.mrb[4].mxu0 %vm53_vm1, %v3174_v59 }
  0xe4   :  { %3321 = vmatmul.mubr.msk.f32.gmra.mrb[4].mxu1 %vm53_vm1, %v3174_v59  ;;  %621 = vmatprep.mubr.f32.mxu0 %v3703_v4  ;;  %v3226_v59 = vld [vmem:[%s4361_s1 + $0x1b0] sm:$0xff] }
  0xe5   :  { %2189 = vmatprep.mubr.f32.mxu1 %v3703_v4 }
  0xe7   :  { %3183 = vmatmul.mubr.msk.f32.gmra.mrb[6].mxu0 %vm53_vm1, %v3175_v60 }
  0xe8   :  { %3322 = vmatmul.mubr.msk.f32.gmra.mrb[6].mxu1 %vm53_vm1, %v3175_v60  ;;  %627 = vmatprep.mubr.f32.mxu0 %v3703_v4  ;;  %v3227_v60 = vld [vmem:[%s4361_s1 + $0x1b8] sm:$0xff] }
  0xe9   :  { %2195 = vmatprep.mubr.f32.mxu1 %v3703_v4 }
  0xeb   :  { %3184 = vmatmul.mubr.msk.f32.gmra.mrb[8].mxu0 %vm53_vm1, %v3176_v61 }
  0xec   :  { %3323 = vmatmul.mubr.msk.f32.gmra.mrb[8].mxu1 %vm53_vm1, %v3176_v61  ;;  %633 = vmatprep.mubr.f32.mxu0 %v3703_v4  ;;  %v1362_v61 = vpop.permute.xlu0 %1361 }
  0xed   :  { %2201 = vmatprep.mubr.f32.mxu1 %v3703_v4  ;;  %v1368_v0 = vsel %vm1367_vm8, %v1362_v61, %v1364_v45 }
  0xef   :  { %3185 = vmatmul.mubr.msk.f32.gmra.mrb[10].mxu0 %vm53_vm1, %v3177_v62 }
  0xf0   :  { %3324 = vmatmul.mubr.msk.f32.gmra.mrb[10].mxu1 %vm53_vm1, %v3177_v62  ;;  %639 = vmatprep.mubr.f32.mxu0 %v3703_v4  ;;  %v2921_v62 = vpop.permute.xlu1 %2920 }
  0xf1   :  { %2207 = vmatprep.mubr.f32.mxu1 %v3703_v4 }
  0xf3   :  { %3186 = vmatmul.mubr.msk.f32.gmra.mrb[12].mxu0 %vm53_vm1, %v3178_v63 }
  0xf4   :  { %3325 = vmatmul.mubr.msk.f32.gmra.mrb[12].mxu1 %vm53_vm1, %v3178_v63  ;;  %645 = vmatprep.mubr.f32.mxu0 %v3703_v4  ;;  %v3236_v63 = vld [vmem:[%s4361_s1 + $0x1c0] sm:$0xff] }
  0xf5   :  { %2213 = vmatprep.mubr.f32.mxu1 %v3703_v4 }
  0xf7   :  { %3187 = vmatmul.mubr.msk.f32.gmra.mrb[14].mxu0 %vm53_vm1, %v3179_v1 }
  0xf8   :  { %3326 = vmatmul.mubr.msk.f32.gmra.mrb[14].mxu1 %vm53_vm1, %v3179_v1  ;;  %773 = vmatprep.mubr.f32.mxu0 %v3703_v4  ;;  %v2926_v1 = vsel %vm1367_vm8, %v2921_v62, %v2923_v50 }
  0xf9   :  { %2339 = vmatprep.mubr.f32.mxu1 %v3703_v4 }
  0xfb   :  { %3196 = vmatmul.mubr.msk.f32.vlgmr.msra.gmra.mrb[0].mxu0 %vm53_vm1, %v3188_v5 }
  0xfc   :  { %880 = vmatpush1.msra.mxu0 %v852_v6  ;;  %3335 = vmatmul.mubr.msk.f32.vlgmr.msra.gmra.mrb[0].mxu1 %vm53_vm1, %v3188_v5  ;;  %v3239_v5 = vld [vmem:[%s4361_s1 + $0x1d8] sm:$0xff]  ;;  %v3240_v6 = vld [vmem:[%s4361_s1 + $0x1e0] sm:$0xff] }
  0xfd   :  { %2444 = vmatpush1.msra.mxu1 %v2416_v7  ;;  %779 = vmatprep.mubr.f32.mxu0 %v3703_v4  ;;  %v3241_v7 = vld [vmem:[%s4361_s1 + $0x1e8] sm:$0xff] }
  0xfe   :  { %2345 = vmatprep.mubr.f32.mxu1 %v3703_v4  ;;  %1049 = vmatprep.subr.mxu0 %v1020_v2  ;;  %v3237_v2 = vld [vmem:[%s4361_s1 + $0x1c8] sm:$0xff] }
  0xff   :  { %3197 = vmatmul.mubr.msk.f32.gmra.mrb[2].mxu0 %vm53_vm1, %v3189_v8  ;;  %2611 = vmatprep.subr.mxu1 %v2583_v9  ;;  %v3243_v9 = vld [vmem:[%s4361_s1 + $0x1f8] sm:$0xff] }
 0x100   :  { %3336 = vmatmul.mubr.msk.f32.gmra.mrb[2].mxu1 %vm53_vm1, %v3189_v8  ;;  %785 = vmatprep.mubr.f32.mxu0 %v3703_v4  ;;  %v3242_v8 = vld [vmem:[%s4361_s1 + $0x1f0] sm:$0xff] }
 0x101   :  { %2351 = vmatprep.mubr.f32.mxu1 %v3703_v4 }
 0x103   :  { %3198 = vmatmul.mubr.msk.f32.gmra.mrb[4].mxu0 %vm53_vm1, %v3190_v10 }
 0x104   :  { %3337 = vmatmul.mubr.msk.f32.gmra.mrb[4].mxu1 %vm53_vm1, %v3190_v10  ;;  %791 = vmatprep.mubr.f32.mxu0 %v3703_v4  ;;  %v3252_v10 = vld [vmem:[%s4361_s1 + $0x200] sm:$0xff] }
 0x105   :  { %2357 = vmatprep.mubr.f32.mxu1 %v3703_v4 }
 0x107   :  { %3199 = vmatmul.mubr.msk.f32.gmra.mrb[6].mxu0 %vm53_vm1, %v3191_v11 }
 0x108   :  { %3338 = vmatmul.mubr.msk.f32.gmra.mrb[6].mxu1 %vm53_vm1, %v3191_v11  ;;  %797 = vmatprep.mubr.f32.mxu0 %v3703_v4  ;;  %v3253_v11 = vld [vmem:[%s4361_s1 + $0x208] sm:$0xff] }
 0x109   :  { %2363 = vmatprep.mubr.f32.mxu1 %v3703_v4 }
 0x10b   :  { %3200 = vmatmul.mubr.msk.f32.gmra.mrb[8].mxu0 %vm53_vm1, %v3192_v12 }
 0x10c   :  { %3339 = vmatmul.mubr.msk.f32.gmra.mrb[8].mxu1 %vm53_vm1, %v3192_v12  ;;  %803 = vmatprep.mubr.f32.mxu0 %v3703_v4  ;;  %v3254_v12 = vld [vmem:[%s4361_s1 + $0x210] sm:$0xff] }
 0x10d   :  { %2369 = vmatprep.mubr.f32.mxu1 %v3703_v4 }
 0x10f   :  { %3201 = vmatmul.mubr.msk.f32.gmra.mrb[10].mxu0 %vm53_vm1, %v3193_v14 }
 0x110   :  { %3340 = vmatmul.mubr.msk.f32.gmra.mrb[10].mxu1 %vm53_vm1, %v3193_v14  ;;  %809 = vmatprep.mubr.f32.mxu0 %v3703_v4  ;;  %v3256_v14 = vld [vmem:[%s4361_s1 + $0x220] sm:$0xff] }
 0x111   :  { %2375 = vmatprep.mubr.f32.mxu1 %v3703_v4 }
 0x113   :  { %3202 = vmatmul.mubr.msk.f32.gmra.mrb[12].mxu0 %vm53_vm1, %v3194_v15 }
 0x114   :  { %3341 = vmatmul.mubr.msk.f32.gmra.mrb[12].mxu1 %vm53_vm1, %v3194_v15  ;;  %815 = vmatprep.mubr.f32.mxu0 %v3703_v4  ;;  %v3257_v15 = vld [vmem:[%s4361_s1 + $0x228] sm:$0xff] }
 0x115   :  { %2381 = vmatprep.mubr.f32.mxu1 %v3703_v4 }
 0x117   :  { %3203 = vmatmul.mubr.msk.f32.gmra.mrb[14].mxu0 %vm53_vm1, %v3195_v17 }
 0x118   :  { %3342 = vmatmul.mubr.msk.f32.gmra.mrb[14].mxu1 %vm53_vm1, %v3195_v17  ;;  %943 = vmatprep.mubr.f32.mxu0 %v3703_v4  ;;  %v3259_v17 = vld [vmem:[%s4361_s1 + $0x238] sm:$0xff]  ;;  %s3712_s1 = smov [#allocation2]  }
 0x119   :  { %2507 = vmatprep.mubr.f32.mxu1 %v3703_v4  ;;  %s3121_s22 = sshll.u32 %s3712_s1, 4  ;;  %s3122_s22 = int_to_ptr.vmem [resolvable:$true] %s3121_s22 }
 0x11a   :  { %s3678_s23 = scalar_lea.vmem %s3122_s22, 4096  ;;  %p3683_p1 = scmp.lt.s32.totalorder %s3122_s22, %s3122_s22 }
 0x11b   :  { %3212 = vmatmul.mubr.msk.f32.vlgmr.msra.gmra.mrb[0].mxu0 %vm53_vm1, %v3204_v20  ;;  %p3679_p0 = scmp.ne.s32.totalorder %s3122_s22, %s3678_s23  ;;  %p3684_p2 = scmp.lt.s32.totalorder %s3678_s23, %s3678_s23 }
 0x11c   :  { %1050 = vmatpush1.msra.mxu0 %v1022_v23  ;;  %3351 = vmatmul.mubr.msk.f32.vlgmr.msra.gmra.mrb[0].mxu1 %vm53_vm1, %v3204_v20 }
 0x11d   :  { %2612 = vmatpush1.msra.mxu1 %v2584_v25  ;;  %949 = vmatprep.mubr.f32.mxu0 %v3703_v4  ;;  %p3685_p3 = por %p3684_p2, %p3683_p1 }
 0x11e   :  { %2513 = vmatprep.mubr.f32.mxu1 %v3703_v4  ;;  %1223 = vmatprep.subr.mxu0 %v1196_v28 }
 0x11f   :  { %3213 = vmatmul.mubr.msk.f32.gmra.mrb[2].mxu0 %vm53_vm1, %v3205_v29  ;;  %2783 = vmatprep.subr.mxu1 %v2756_v30  ;;  %p3686_p4 = pnand %p3685_p3, %p3679_p0 }
 0x120   :  { %3352 = vmatmul.mubr.msk.f32.gmra.mrb[2].mxu1 %vm53_vm1, %v3205_v29  ;;  %955 = vmatprep.mubr.f32.mxu0 %v3703_v4 }
 0x121   :  { %2519 = vmatprep.mubr.f32.mxu1 %v3703_v4  ;;  %v1528_v18 = vpop.permute.xlu0 %1527 }
 0x122   :  { %v1533_v20 = vpop.permute.xlu1 %1532 }
 0x123   :  { %3214 = vmatmul.mubr.msk.f32.gmra.mrb[4].mxu0 %vm53_vm1, %v3206_v33 }
 0x124   :  { %3353 = vmatmul.mubr.msk.f32.gmra.mrb[4].mxu1 %vm53_vm1, %v3206_v33  ;;  %961 = vmatprep.mubr.f32.mxu0 %v3703_v4 }
 0x125   :  { %2525 = vmatprep.mubr.f32.mxu1 %v3703_v4 }
 0x126   :  { %v1538_v34 = vpop.permute.xlu1 %1537 }
 0x127   :  { %3215 = vmatmul.mubr.msk.f32.gmra.mrb[6].mxu0 %vm53_vm1, %v3207_v36 }
 0x128   :  { %3354 = vmatmul.mubr.msk.f32.gmra.mrb[6].mxu1 %vm53_vm1, %v3207_v36  ;;  %967 = vmatprep.mubr.f32.mxu0 %v3703_v4 }
 0x129   :  { %2531 = vmatprep.mubr.f32.mxu1 %v3703_v4 }
 0x12b   :  { %3216 = vmatmul.mubr.msk.f32.gmra.mrb[8].mxu0 %vm53_vm1, %v3208_v39 }
 0x12c   :  { %3355 = vmatmul.mubr.msk.f32.gmra.mrb[8].mxu1 %vm53_vm1, %v3208_v39  ;;  %973 = vmatprep.mubr.f32.mxu0 %v3703_v4 }
 0x12d   :  { %2537 = vmatprep.mubr.f32.mxu1 %v3703_v4 }
 0x12f   :  { %3217 = vmatmul.mubr.msk.f32.gmra.mrb[10].mxu0 %vm53_vm1, %v3209_v40 }
 0x130   :  { %3356 = vmatmul.mubr.msk.f32.gmra.mrb[10].mxu1 %vm53_vm1, %v3209_v40  ;;  %979 = vmatprep.mubr.f32.mxu0 %v3703_v4 }
 0x131   :  { %2543 = vmatprep.mubr.f32.mxu1 %v3703_v4 }
 0x133   :  { %3218 = vmatmul.mubr.msk.f32.gmra.mrb[12].mxu0 %vm53_vm1, %v3210_v41 }
 0x134   :  { %3357 = vmatmul.mubr.msk.f32.gmra.mrb[12].mxu1 %vm53_vm1, %v3210_v41  ;;  %985 = vmatprep.mubr.f32.mxu0 %v3703_v4 }
 0x135   :  { %2549 = vmatprep.mubr.f32.mxu1 %v3703_v4 }
 0x137   :  { %3219 = vmatmul.mubr.msk.f32.gmra.mrb[14].mxu0 %vm53_vm1, %v3211_v44 }
 0x138   :  { %3358 = vmatmul.mubr.msk.f32.gmra.mrb[14].mxu1 %vm53_vm1, %v3211_v44  ;;  %1113 = vmatprep.mubr.f32.mxu0 %v3703_v4  ;;  %v1543_v44 = vpop.permute.xlu0 %1542 }
 0x139   :  { %2675 = vmatprep.mubr.f32.mxu1 %v3703_v4 }
 0x13b   :  { %3228 = vmatmul.mubr.msk.f32.vlgmr.msra.gmra.mrb[0].mxu0 %vm53_vm1, %v3220_v47 }
 0x13c   :  { %1224 = vmatpush1.msra.mxu0 %v1195_v48  ;;  %3367 = vmatmul.mubr.msk.f32.vlgmr.msra.gmra.mrb[0].mxu1 %vm53_vm1, %v3220_v47  ;;  %v1553_v62 = vpop.permute.xlu0 %1552 }
 0x13d   :  { %2784 = vmatpush1.msra.mxu1 %v2755_v49  ;;  %1119 = vmatprep.mubr.f32.mxu0 %v3703_v4 }
 0x13e   :  { %2681 = vmatprep.mubr.f32.mxu1 %v3703_v4  ;;  %1396 = vmatprep.subr.mxu0 %v1369_v52 }
 0x13f   :  { %3229 = vmatmul.mubr.msk.f32.gmra.mrb[2].mxu0 %vm53_vm1, %v3221_v53  ;;  %2954 = vmatprep.subr.mxu1 %v2927_v54 }
 0x140   :  { %3368 = vmatmul.mubr.msk.f32.gmra.mrb[2].mxu1 %vm53_vm1, %v3221_v53  ;;  %1125 = vmatprep.mubr.f32.mxu0 %v3703_v4  ;;  %v1548_v53 = vpop.permute.xlu1 %1547 }
 0x141   :  { %2687 = vmatprep.mubr.f32.mxu1 %v3703_v4 }
 0x143   :  { %3230 = vmatmul.mubr.msk.f32.gmra.mrb[4].mxu0 %vm53_vm1, %v3222_v55 }
 0x144   :  { %3369 = vmatmul.mubr.msk.f32.gmra.mrb[4].mxu1 %vm53_vm1, %v3222_v55  ;;  %1131 = vmatprep.mubr.f32.mxu0 %v3703_v4 }
 0x145   :  { %2693 = vmatprep.mubr.f32.mxu1 %v3703_v4 }
 0x147   :  { %3231 = vmatmul.mubr.msk.f32.gmra.mrb[6].mxu0 %vm53_vm1, %v3223_v56 }
 0x148   :  { %3370 = vmatmul.mubr.msk.f32.gmra.mrb[6].mxu1 %vm53_vm1, %v3223_v56  ;;  %1137 = vmatprep.mubr.f32.mxu0 %v3703_v4 }
 0x149   :  { %2699 = vmatprep.mubr.f32.mxu1 %v3703_v4 }
 0x14b   :  { %3232 = vmatmul.mubr.msk.f32.gmra.mrb[8].mxu0 %vm53_vm1, %v3224_v57 }
 0x14c   :  { %3371 = vmatmul.mubr.msk.f32.gmra.mrb[8].mxu1 %vm53_vm1, %v3224_v57  ;;  %1143 = vmatprep.mubr.f32.mxu0 %v3703_v4 }
 0x14d   :  { %2705 = vmatprep.mubr.f32.mxu1 %v3703_v4 }
 0x14f   :  { %3233 = vmatmul.mubr.msk.f32.gmra.mrb[10].mxu0 %vm53_vm1, %v3225_v58 }
 0x150   :  { %3372 = vmatmul.mubr.msk.f32.gmra.mrb[10].mxu1 %vm53_vm1, %v3225_v58  ;;  %1149 = vmatprep.mubr.f32.mxu0 %v3703_v4 }
 0x151   :  { %2711 = vmatprep.mubr.f32.mxu1 %v3703_v4 }
 0x153   :  { %3234 = vmatmul.mubr.msk.f32.gmra.mrb[12].mxu0 %vm53_vm1, %v3226_v59 }
 0x154   :  { %3373 = vmatmul.mubr.msk.f32.gmra.mrb[12].mxu1 %vm53_vm1, %v3226_v59  ;;  %1155 = vmatprep.mubr.f32.mxu0 %v3703_v4 }
 0x155   :  { %2717 = vmatprep.mubr.f32.mxu1 %v3703_v4 }
 0x157   :  { %3235 = vmatmul.mubr.msk.f32.gmra.mrb[14].mxu0 %vm53_vm1, %v3227_v60 }
 0x158   :  { %3374 = vmatmul.mubr.msk.f32.gmra.mrb[14].mxu1 %vm53_vm1, %v3227_v60  ;;  %1287 = vmatprep.mubr.f32.mxu0 %v3703_v4 }
 0x159   :  { %2847 = vmatprep.mubr.f32.mxu1 %v3703_v4 }
 0x15b   :  { %3244 = vmatmul.mubr.msk.f32.vlgmr.msra.gmra.mrb[0].mxu0 %vm53_vm1, %v3236_v63 }
 0x15c   :  { %1397 = vmatpush1.msra.mxu0 %v1368_v0  ;;  %3383 = vmatmul.mubr.msk.f32.vlgmr.msra.gmra.mrb[0].mxu1 %vm53_vm1, %v3236_v63 }
 0x15d   :  { %2955 = vmatpush1.msra.mxu1 %v2926_v1  ;;  %1293 = vmatprep.mubr.f32.mxu0 %v3703_v4 }
 0x15e   :  { %2853 = vmatprep.mubr.f32.mxu1 %v3703_v4 }
 0x15f   :  { %3245 = vmatmul.mubr.msk.f32.gmra.mrb[2].mxu0 %vm53_vm1, %v3237_v2 }
 0x160   :  { %3384 = vmatmul.mubr.msk.f32.gmra.mrb[2].mxu1 %vm53_vm1, %v3237_v2  ;;  %1299 = vmatprep.mubr.f32.mxu0 %v3703_v4 }
 0x161   :  { %2859 = vmatprep.mubr.f32.mxu1 %v3703_v4 }
 0x163   :  { %3246 = vmatmul.mubr.msk.f32.gmra.mrb[4].mxu0 %vm53_vm1, %v3238_v3 }
 0x164   :  { %3385 = vmatmul.mubr.msk.f32.gmra.mrb[4].mxu1 %vm53_vm1, %v3238_v3  ;;  %1305 = vmatprep.mubr.f32.mxu0 %v3703_v4 }
 0x165   :  { %2865 = vmatprep.mubr.f32.mxu1 %v3703_v4 }
 0x167   :  { %3247 = vmatmul.mubr.msk.f32.gmra.mrb[6].mxu0 %vm53_vm1, %v3239_v5 }
 0x168   :  { %3386 = vmatmul.mubr.msk.f32.gmra.mrb[6].mxu1 %vm53_vm1, %v3239_v5  ;;  %1311 = vmatprep.mubr.f32.mxu0 %v3703_v4 }
 0x169   :  { %2871 = vmatprep.mubr.f32.mxu1 %v3703_v4 }
 0x16b   :  { %3248 = vmatmul.mubr.msk.f32.gmra.mrb[8].mxu0 %vm53_vm1, %v3240_v6 }
 0x16c   :  { %3387 = vmatmul.mubr.msk.f32.gmra.mrb[8].mxu1 %vm53_vm1, %v3240_v6  ;;  %1317 = vmatprep.mubr.f32.mxu0 %v3703_v4 }
 0x16d   :  { %2877 = vmatprep.mubr.f32.mxu1 %v3703_v4 }
 0x16f   :  { %3249 = vmatmul.mubr.msk.f32.gmra.mrb[10].mxu0 %vm53_vm1, %v3241_v7 }
 0x170   :  { %3388 = vmatmul.mubr.msk.f32.gmra.mrb[10].mxu1 %vm53_vm1, %v3241_v7  ;;  %1323 = vmatprep.mubr.f32.mxu0 %v3703_v4 }
 0x171   :  { %2883 = vmatprep.mubr.f32.mxu1 %v3703_v4 }
 0x173   :  { %3250 = vmatmul.mubr.msk.f32.gmra.mrb[12].mxu0 %vm53_vm1, %v3242_v8 }
 0x174   :  { %3389 = vmatmul.mubr.msk.f32.gmra.mrb[12].mxu1 %vm53_vm1, %v3242_v8  ;;  %1329 = vmatprep.mubr.f32.mxu0 %v3703_v4  ;;  %v1558_v8 = vpop.permute.xlu1 %1557 }
 0x175   :  { %2889 = vmatprep.mubr.f32.mxu1 %v3703_v4 }
 0x177   :  { %3251 = vmatmul.mubr.msk.f32.gmra.mrb[14].mxu0 %vm53_vm1, %v3243_v9 }
 0x178   :  { %3390 = vmatmul.mubr.msk.f32.gmra.mrb[14].mxu1 %vm53_vm1, %v3243_v9  ;;  %1460 = vmatprep.mubr.f32.mxu0 %v3703_v4 }
 0x179   :  { %3018 = vmatprep.mubr.f32.mxu1 %v3703_v4 }
 0x17b   :  { %3260 = vmatmul.mubr.msk.f32.vlgmr.msra.gmra.mrb[0].mxu0 %vm53_vm1, %v3252_v10 }
 0x17c   :  { %3399 = vmatmul.mubr.msk.f32.vlgmr.msra.gmra.mrb[0].mxu1 %vm53_vm1, %v3252_v10  ;;  %1466 = vmatprep.mubr.f32.mxu0 %v3703_v4 }
 0x17d   :  { %3024 = vmatprep.mubr.f32.mxu1 %v3703_v4 }
 0x17f   :  { %3261 = vmatmul.mubr.msk.f32.gmra.mrb[2].mxu0 %vm53_vm1, %v3253_v11 }
 0x180   :  { %3400 = vmatmul.mubr.msk.f32.gmra.mrb[2].mxu1 %vm53_vm1, %v3253_v11  ;;  %1472 = vmatprep.mubr.f32.mxu0 %v3703_v4 }
 0x181   :  { %3030 = vmatprep.mubr.f32.mxu1 %v3703_v4 }
 0x183   :  { %3262 = vmatmul.mubr.msk.f32.gmra.mrb[4].mxu0 %vm53_vm1, %v3254_v12 }
 0x184   :  { %3401 = vmatmul.mubr.msk.f32.gmra.mrb[4].mxu1 %vm53_vm1, %v3254_v12  ;;  %1478 = vmatprep.mubr.f32.mxu0 %v3703_v4 }
 0x185   :  { %3036 = vmatprep.mubr.f32.mxu1 %v3703_v4 }
 0x187   :  { %3263 = vmatmul.mubr.msk.f32.gmra.mrb[6].mxu0 %vm53_vm1, %v3255_v13 }
 0x188   :  { %3402 = vmatmul.mubr.msk.f32.gmra.mrb[6].mxu1 %vm53_vm1, %v3255_v13  ;;  %1484 = vmatprep.mubr.f32.mxu0 %v3703_v4 }
 0x189   :  { %3042 = vmatprep.mubr.f32.mxu1 %v3703_v4 }
 0x18b   :  { %3264 = vmatmul.mubr.msk.f32.gmra.mrb[8].mxu0 %vm53_vm1, %v3256_v14 }
 0x18c   :  { %3403 = vmatmul.mubr.msk.f32.gmra.mrb[8].mxu1 %vm53_vm1, %v3256_v14  ;;  %1490 = vmatprep.mubr.f32.mxu0 %v3703_v4 }
 0x18d   :  { %3048 = vmatprep.mubr.f32.mxu1 %v3703_v4 }
 0x18f   :  { %3265 = vmatmul.mubr.msk.f32.gmra.mrb[10].mxu0 %vm53_vm1, %v3257_v15 }
 0x190   :  { %3404 = vmatmul.mubr.msk.f32.gmra.mrb[10].mxu1 %vm53_vm1, %v3257_v15  ;;  %1496 = vmatprep.mubr.f32.mxu0 %v3703_v4 }
 0x191   :  { %3054 = vmatprep.mubr.f32.mxu1 %v3703_v4 }
 0x193   :  { %3266 = vmatmul.mubr.msk.f32.gmra.mrb[12].mxu0 %vm53_vm1, %v3258_v16 }
 0x194   :  { %3405 = vmatmul.mubr.msk.f32.gmra.mrb[12].mxu1 %vm53_vm1, %v3258_v16  ;;  %1502 = vmatprep.mubr.f32.mxu0 %v3703_v4 }
 0x195   :  { %3060 = vmatprep.mubr.f32.mxu1 %v3703_v4 }
 0x197   :  { %3267 = vmatmul.mubr.msk.f32.gmra.mrb[14].mxu0 %vm53_vm1, %v3259_v17 }
 0x198   :  { %3406 = vmatmul.mubr.msk.f32.gmra.mrb[14].mxu1 %vm53_vm1, %v3259_v17  ;;  %v1563_v17 = vpop.permute.xlu0 %1562 }
 0x24e   :  { %v1462_v19 = vpop.f32.mrb[0].mxu0 }
 0x24f   :  { %v3020_v21 = vpop.f32.mrb[0].mxu1  ;;  %v1565_v22 = vadd.f32 %v1528_v18, %v1462_v19  ;;  %v1464_v23 = vpop.f32.mrb[1].mxu0 }
 0x250   :  { %v3083_v24 = vadd.f32 %v3020_v21, %v1528_v18  ;;  %v1566_v25 = vadd.f32 %v1528_v18, %v1464_v23  ;;  %v3022_v26 = vpop.f32.mrb[1].mxu1 }
 0x251   :  { %1581 = vst [vmem:[#allocation2] sm:$0xff] %v1565_v22  ;;  %v3084_v27 = vadd.f32 %v3022_v26, %v1528_v18 }
 0x252   :  { %3100 = vst [vmem:[#allocation2 + $0x80] sm:$0xff] %v3083_v24  ;;  %1582 = vst.msk [vmem:[#allocation2 + $0x8] sm:$0xff] %vm1021_vm6, %v1566_v25  ;;  %v1468_v28 = vpop.f32.mrb[2].mxu0 }
 0x253   :  { %3101 = vst.msk [vmem:[#allocation2 + $0x88] sm:$0xff] %vm1021_vm6, %v3084_v27  ;;  %v3026_v4 = vpop.f32.mrb[2].mxu1  ;;  %v1567_v29 = vadd.f32 %v1533_v20, %v1468_v28  ;;  %v1470_v30 = vpop.f32.mrb[3].mxu0 }
 0x254   :  { %v3085_v31 = vadd.f32 %v3026_v4, %v1533_v20  ;;  %v1568_v32 = vadd.f32 %v1533_v20, %v1470_v30  ;;  %v3028_v33 = vpop.f32.mrb[3].mxu1 }
 0x255   :  { %1583 = vst [vmem:[#allocation2 + $0x10] sm:$0xff] %v1567_v29  ;;  %v3086_v35 = vadd.f32 %v3028_v33, %v1533_v20 }
 0x256   :  { %3102 = vst [vmem:[#allocation2 + $0x90] sm:$0xff] %v3085_v31  ;;  %1584 = vst.msk [vmem:[#allocation2 + $0x18] sm:$0xff] %vm1021_vm6, %v1568_v32  ;;  %v1474_v36 = vpop.f32.mrb[4].mxu0 }
 0x257   :  { %3103 = vst.msk [vmem:[#allocation2 + $0x98] sm:$0xff] %vm1021_vm6, %v3086_v35  ;;  %v3032_v37 = vpop.f32.mrb[4].mxu1  ;;  %v1569_v38 = vadd.f32 %v1538_v34, %v1474_v36  ;;  %v1476_v39 = vpop.f32.mrb[5].mxu0 }
 0x258   :  { %v3087_v40 = vadd.f32 %v3032_v37, %v1538_v34  ;;  %v1570_v41 = vadd.f32 %v1538_v34, %v1476_v39  ;;  %v3034_v42 = vpop.f32.mrb[5].mxu1 }
 0x259   :  { %1585 = vst [vmem:[#allocation2 + $0x20] sm:$0xff] %v1569_v38  ;;  %v3088_v43 = vadd.f32 %v3034_v42, %v1538_v34 }
 0x25a   :  { %3104 = vst [vmem:[#allocation2 + $0xa0] sm:$0xff] %v3087_v40  ;;  %1586 = vst.msk [vmem:[#allocation2 + $0x28] sm:$0xff] %vm1021_vm6, %v1570_v41  ;;  %v1480_v45 = vpop.f32.mrb[6].mxu0 }
 0x25b   :  { %3105 = vst.msk [vmem:[#allocation2 + $0xa8] sm:$0xff] %vm1021_vm6, %v3088_v43  ;;  %v1571_v46 = vadd.f32 %v1543_v44, %v1480_v45  ;;  %v3038_v47 = vpop.f32.mrb[6].mxu1  ;;  %v1482_v48 = vpop.f32.mrb[7].mxu0 }
 0x25c   :  { %v3089_v49 = vadd.f32 %v3038_v47, %v1543_v44  ;;  %v1572_v50 = vadd.f32 %v1543_v44, %v1482_v48  ;;  %v3040_v51 = vpop.f32.mrb[7].mxu1 }
 0x25d   :  { %1587 = vst [vmem:[#allocation2 + $0x30] sm:$0xff] %v1571_v46  ;;  %v3090_v52 = vadd.f32 %v3040_v51, %v1543_v44 }
 0x25e   :  { %3106 = vst [vmem:[#allocation2 + $0xb0] sm:$0xff] %v3089_v49  ;;  %1588 = vst.msk [vmem:[#allocation2 + $0x38] sm:$0xff] %vm1021_vm6, %v1572_v50  ;;  %v1486_v54 = vpop.f32.mrb[8].mxu0 }
 0x25f   :  { %3107 = vst.msk [vmem:[#allocation2 + $0xb8] sm:$0xff] %vm1021_vm6, %v3090_v52  ;;  %v1573_v55 = vadd.f32 %v1548_v53, %v1486_v54  ;;  %v3044_v56 = vpop.f32.mrb[8].mxu1  ;;  %v1488_v57 = vpop.f32.mrb[9].mxu0 }
 0x260   :  { %v3091_v58 = vadd.f32 %v3044_v56, %v1548_v53  ;;  %v1574_v59 = vadd.f32 %v1548_v53, %v1488_v57  ;;  %v3046_v60 = vpop.f32.mrb[9].mxu1 }
 0x261   :  { %1589 = vst [vmem:[#allocation2 + $0x40] sm:$0xff] %v1573_v55  ;;  %v3092_v61 = vadd.f32 %v3046_v60, %v1548_v53 }
 0x262   :  { %3108 = vst [vmem:[#allocation2 + $0xc0] sm:$0xff] %v3091_v58  ;;  %1590 = vst.msk [vmem:[#allocation2 + $0x48] sm:$0xff] %vm1021_vm6, %v1574_v59  ;;  %v1492_v63 = vpop.f32.mrb[10].mxu0 }
 0x263   :  { %3109 = vst.msk [vmem:[#allocation2 + $0xc8] sm:$0xff] %vm1021_vm6, %v3092_v61  ;;  %v1575_v0 = vadd.f32 %v1553_v62, %v1492_v63  ;;  %v3050_v1 = vpop.f32.mrb[10].mxu1  ;;  %v1494_v2 = vpop.f32.mrb[11].mxu0 }
 0x264   :  { %v3093_v3 = vadd.f32 %v3050_v1, %v1553_v62  ;;  %v1576_v5 = vadd.f32 %v1553_v62, %v1494_v2  ;;  %v3052_v6 = vpop.f32.mrb[11].mxu1 }
 0x265   :  { %1591 = vst [vmem:[#allocation2 + $0x50] sm:$0xff] %v1575_v0  ;;  %v3094_v7 = vadd.f32 %v3052_v6, %v1553_v62 }
 0x266   :  { %3110 = vst [vmem:[#allocation2 + $0xd0] sm:$0xff] %v3093_v3  ;;  %1592 = vst.msk [vmem:[#allocation2 + $0x58] sm:$0xff] %vm1021_vm6, %v1576_v5  ;;  %v1498_v9 = vpop.f32.mrb[12].mxu0 }
 0x267   :  { %3111 = vst.msk [vmem:[#allocation2 + $0xd8] sm:$0xff] %vm1021_vm6, %v3094_v7  ;;  %v1577_v10 = vadd.f32 %v1558_v8, %v1498_v9  ;;  %v3056_v11 = vpop.f32.mrb[12].mxu1  ;;  %v1500_v12 = vpop.f32.mrb[13].mxu0 }
 0x268   :  { %v3095_v13 = vadd.f32 %v3056_v11, %v1558_v8  ;;  %v1578_v14 = vadd.f32 %v1558_v8, %v1500_v12  ;;  %v3058_v15 = vpop.f32.mrb[13].mxu1 }
 0x269   :  { %1593 = vst [vmem:[#allocation2 + $0x60] sm:$0xff] %v1577_v10  ;;  %v3096_v16 = vadd.f32 %v3058_v15, %v1558_v8 }
 0x26a   :  { %3112 = vst [vmem:[#allocation2 + $0xe0] sm:$0xff] %v3095_v13  ;;  %1594 = vst.msk [vmem:[#allocation2 + $0x68] sm:$0xff] %vm1021_vm6, %v1578_v14  ;;  %v1504_v18 = vpop.f32.mrb[14].mxu0 }
 0x26b   :  { %3113 = vst.msk [vmem:[#allocation2 + $0xe8] sm:$0xff] %vm1021_vm6, %v3096_v16  ;;  %v1579_v19 = vadd.f32 %v1563_v17, %v1504_v18  ;;  %v3062_v20 = vpop.f32.mrb[14].mxu1  ;;  %v1506_v21 = vpop.f32.mrb[15].mxu0 }
 0x26c   :  { %v3097_v22 = vadd.f32 %v3062_v20, %v1563_v17  ;;  %v1580_v23 = vadd.f32 %v1563_v17, %v1506_v21  ;;  %v3064_v24 = vpop.f32.mrb[15].mxu1 }
 0x26d   :  { %1595 = vst [vmem:[#allocation2 + $0x70] sm:$0xff] %v1579_v19  ;;  %v3098_v25 = vadd.f32 %v3064_v24, %v1563_v17 }
 0x26e   :  { %3114 = vst [vmem:[#allocation2 + $0xf0] sm:$0xff] %v3097_v22  ;;  %1596 = vst.msk [vmem:[#allocation2 + $0x78] sm:$0xff] %vm1021_vm6, %v1580_v23 }
 0x26f   :  { %3115 = vst.msk [vmem:[#allocation2 + $0xf8] sm:$0xff] %vm1021_vm6, %v3098_v25 }
 0x270   :  { %3689 = shalt.err (!%p3686_p4)
}
 0x271   :  { %s3690_s26 = scalar_lea.hbm %s4363_s3, 4096 }
 0x272   :  { %p3691_p5 = scmp.ne.s32.totalorder %s4363_s3, %s3690_s26  ;;  %p3694_p6 = scmp.lt.u32.totalorder %s3690_s26, %s4363_s3 }
 0x274   :  { %p3696_p7 = pnand %p3694_p6, %p3691_p5 }
 0x276   :  { %3699 = shalt.err (!%p3696_p7)
}
 0x277   :  { %s3713_s30 = smov 256   ;;  %s3714_s4 = smov 16  }
 0x278   :  { %3127 = dma.vmem_to_hbm [thread:$0]  %s3122_s22, 4096, %s4363_s3, [#allocation3], %s3713_s30, %s3713_s30, %s3714_s4  }
 0x279   :  { %3700 = dma.done.wait [#allocation3], 4096  }
 0x27a   :  { %3701 = vsyncadd [#allocation3], 4294963200 }
 0x27b   :  { %3131 = vsyncpa [#allocation3], 1 }

</bundles_post_ra>
